<compile_context>
chip_gen: v5e
topology: v5e:2x2
jax: 0.10.0
libtpu: 0.0.40
codegen_flags: <defaults>
</compile_context>

<pallas_src>
import functools
import math

import numpy as np
import jax
import jax.numpy as jnp
from jax.experimental import pallas as pl
from jax.experimental.pallas import tpu as pltpu

# --- small synthetic config consistent with the module's __init__ ---
N_HEADS = 2
D_MODEL = 32
D_HEAD = 16
MAX_SEQ_LEN = 8
B = 2
S = 8
HD = N_HEADS * D_HEAD  # 32


def _attention_kernel(x_ref, wqkv_ref, wob_ref, mask_ref, o_ref):
    """Fused QKV + block-diagonal causal attention + merged output projection.

    x_ref:    (rows, D_MODEL)     bf16, flattened (batch, seq) tokens
    wqkv_ref: (D_MODEL, 3*HD)     bf16, pre-transposed [Wq*scale ; Wk ; Wv]
    wob_ref:  (HD + 1, D_MODEL)   bf16, rows 0..HD-1 = Wo^T, row HD = bias
    mask_ref: (rows, rows)        f32 additive bias: 0 attendable, -1e30 masked
    o_ref:    (rows, D_MODEL)     f32
    """
    # Single fused QKV projection on the MXU (bf16 operands, f32 accumulate).
    qkv = jnp.dot(x_ref[...], wqkv_ref[...],
                  preferred_element_type=jnp.float32)            # (rows, 3*HD) f32

    mask_bias = mask_ref[...]                                    # (rows, rows) f32

    pv_heads = []
    for h in range(N_HEADS):                                     # static unroll
        lo = h * D_HEAD
        qh = qkv[:, lo:lo + D_HEAD].astype(jnp.bfloat16)         # scale pre-folded
        kh = qkv[:, HD + lo:HD + lo + D_HEAD].astype(jnp.bfloat16)
        vh = qkv[:, 2 * HD + lo:2 * HD + lo + D_HEAD].astype(jnp.bfloat16)

        # q @ k^T without materializing a transpose (contract last dims of both).
        s = jax.lax.dot_general(qh, kh, (((1,), (1,)), ((), ())),
                                preferred_element_type=jnp.float32)  # (rows, rows)
        s = s + mask_bias                                        # one vadd masks

        # Numerically stable softmax in f32; normalization deferred past PV.
        m = jnp.max(s, axis=-1, keepdims=True)
        p = jnp.exp(s - m)
        l = jnp.sum(p, axis=-1, keepdims=True)
        pv = jnp.dot(p.astype(jnp.bfloat16), vh,
                     preferred_element_type=jnp.float32)         # (rows, D_HEAD)
        pv_heads.append(pv / l)                                  # exact normalize

    # One merged output projection (single MXU push) + bias row.
    wob = wob_ref[...]                                           # (HD+1, D_MODEL) bf16
    pv_all = jnp.concatenate(pv_heads, axis=-1).astype(jnp.bfloat16)  # (rows, HD)
    out = jnp.dot(pv_all, wob[:HD, :], preferred_element_type=jnp.float32)
    out = out + wob[HD:HD + 1, :].astype(jnp.float32)
    o_ref[...] = out.astype(o_ref.dtype)


def prepare_attention_params(wq, wk, wv, wo, bo):
    """One-time host-side weight prep (hoisted out of the per-call hot path).

    Returns:
      wqkv_t: (D_MODEL, 3*HD) bf16 — fused, pre-transposed, Q-scale folded in.
      wob:    (HD+1, D_MODEL) bf16 — Wo^T with the output bias packed as last row.
    """
    scale = 1.0 / math.sqrt(D_HEAD)
    wqkv_t = jnp.concatenate([wq * scale, wk, wv], axis=0).T     # (D_MODEL, 3*HD)
    wob = jnp.concatenate([wo.T, bo], axis=0)                    # (HD+1, D_MODEL)
    return wqkv_t.astype(jnp.bfloat16), wob.astype(jnp.bfloat16)


def attention_forward(x, wqkv_t, wob):
    b, s, d = x.shape
    assert d == D_MODEL and s <= MAX_SEQ_LEN

    rows = b * s
    x_flat = x.reshape(rows, d).astype(jnp.bfloat16)             # bf16 MXU operand

    # Block-diagonal causal mask over the flattened batch*seq axis, built with
    # numpy (rows/s are Python ints) and passed as an additive 0/-1e30 bias.
    r = np.arange(rows)[:, None]
    c = np.arange(rows)[None, :]
    allowed = ((r // s) == (c // s)) & ((c % s) <= (r % s))
    mask_bias = jnp.asarray(np.where(allowed, 0.0, -1e30).astype(np.float32))

    out_flat = pl.pallas_call(
        _attention_kernel,
        out_shape=jax.ShapeDtypeStruct((rows, D_MODEL), jnp.float32),
        grid_spec=pltpu.PrefetchScalarGridSpec(
            num_scalar_prefetch=0,
            grid=(1,),                                           # whole batch folded
            in_specs=[
                pl.BlockSpec((rows, D_MODEL), lambda i: (0, 0)),      # x tokens
                pl.BlockSpec((D_MODEL, 3 * HD), lambda i: (0, 0)),    # fused Wqkv^T
                pl.BlockSpec((HD + 1, D_MODEL), lambda i: (0, 0)),    # [Wo^T ; bias]
                pl.BlockSpec((rows, rows), lambda i: (0, 0)),         # mask bias
            ],
            out_specs=pl.BlockSpec((rows, D_MODEL), lambda i: (0, 0)),
        ),
        compiler_params=pltpu.CompilerParams(
            dimension_semantics=("arbitrary",)),
    )(x_flat, wqkv_t, wob, mask_bias)

    return out_flat.reshape(b, s, D_MODEL)


def reference_forward(x, wq, wk, wv, wo, bo):
    """Pure-JAX f32 reference mirroring the PyTorch forward (unfused weights)."""
    b, s, _ = x.shape
    q = x @ wq.T
    k = x @ wk.T
    v = x @ wv.T

    def split(t):  # 'b s (h d) -> b h s d'
        return t.reshape(b, s, N_HEADS, D_HEAD).transpose(0, 2, 1, 3)

    qs, ks, vs = split(q), split(k), split(v)
    scale = 1.0 / math.sqrt(D_HEAD)
    scores = jnp.einsum("bhqd,bhkd->bhqk", qs, ks) * scale
    causal = jnp.tril(jnp.ones((s, s), dtype=bool))
    scores = jnp.where(causal[None, None], scores, -jnp.inf)
    p = jax.nn.softmax(scores, axis=-1)
    hw = jnp.einsum("bhqk,bhkd->bhqd", p, vs)
    cat = hw.transpose(0, 2, 1, 3).reshape(b, s, HD)  # 'b h q d -> b q (h d)'
    return cat @ wo.T + bo[0]


if __name__ == "__main__":
    key = jax.random.PRNGKey(0)
    kx, kq, kk, kv, kwo = jax.random.split(key, 5)

    # deterministic parameter init mirroring the module's __init__
    std_qk = math.sqrt(2.0 / (D_MODEL + D_HEAD))
    wq = std_qk * jax.random.normal(kq, (HD, D_MODEL), dtype=jnp.float32)
    wk = std_qk * jax.random.normal(kk, (HD, D_MODEL), dtype=jnp.float32)
    wv = jax.random.uniform(
        kv, (HD, D_MODEL), dtype=jnp.float32,
        minval=-1.0 / math.sqrt(D_MODEL), maxval=1.0 / math.sqrt(D_MODEL))
    wo = jax.random.uniform(
        kwo, (D_MODEL, HD), dtype=jnp.float32,
        minval=-1.0 / math.sqrt(HD), maxval=1.0 / math.sqrt(HD))
    bo = jnp.zeros((1, D_MODEL), dtype=jnp.float32)  # nn.init.zeros_(O.bias)

    x = jax.random.normal(kx, (B, S, D_MODEL), dtype=jnp.float32)

    # One-time weight prep, outside the per-call hot path.
    wqkv_t, wob = jax.block_until_ready(prepare_attention_params(wq, wk, wv, wo, bo))

    fwd = jax.jit(attention_forward)
    out = jax.block_until_ready(fwd(x, wqkv_t, wob))

    ref = reference_forward(x, wq, wk, wv, wo, bo)
    assert out.shape == (B, S, D_MODEL)
    # Tolerance set for bf16 MXU operands (f32 accumulation, f32 softmax).
    assert jnp.allclose(out, ref, atol=2e-2, rtol=2e-2), "mismatch vs JAX reference"

    print("KERNEL_OK")
</pallas_src>

<mosaic_0001>
module attributes {stable_mosaic.version = 11 : i64} {
  func.func @_attention_kernel(%arg0: i32, %arg1: memref<16x32xbf16, #tpu.memory_space<vmem>>, %arg2: memref<32x96xbf16, #tpu.memory_space<vmem>>, %arg3: memref<33x32xbf16, #tpu.memory_space<vmem>>, %arg4: memref<16x16xf32, #tpu.memory_space<vmem>>, %arg5: memref<16x32xf32, #tpu.memory_space<vmem>>) attributes {dimension_semantics = [#tpu.dimension_semantics<arbitrary>], iteration_bounds = array<i64: 1>, scalar_prefetch = 0 : i64, scratch_operands = 0 : i64, tpu.core_type = #tpu.core_type<tc>, window_params = [{pipeline_mode = #tpu.pipeline_mode<synchronous>, transform_indices = @transform_0, window_bounds = array<i64: 16, 32>}, {pipeline_mode = #tpu.pipeline_mode<synchronous>, transform_indices = @transform_1, window_bounds = array<i64: 32, 96>}, {pipeline_mode = #tpu.pipeline_mode<synchronous>, transform_indices = @transform_2, window_bounds = array<i64: 33, 32>}, {pipeline_mode = #tpu.pipeline_mode<synchronous>, transform_indices = @transform_3, window_bounds = array<i64: 16, 16>}, {pipeline_mode = #tpu.pipeline_mode<synchronous>, transform_indices = @transform_4, window_bounds = array<i64: 16, 32>}]} {
    %c0 = arith.constant 0 : index
    %c0_0 = arith.constant 0 : index
    %0 = vector.load %arg1[%c0, %c0_0] : memref<16x32xbf16, #tpu.memory_space<vmem>>, vector<16x32xbf16>
    %c0_1 = arith.constant 0 : index
    %c0_2 = arith.constant 0 : index
    %1 = vector.load %arg2[%c0_1, %c0_2] : memref<32x96xbf16, #tpu.memory_space<vmem>>, vector<32x96xbf16>
    %cst = arith.constant dense<0.000000e+00> : vector<16x96xf32>
    %2 = tpu.matmul %0, %1, %cst {dimension_numbers = #tpu.dot_dimension_numbers<[1], [0], [0], [1], [0, 0, 1, 1], [], []>} : vector<16x32xbf16>, vector<32x96xbf16>, vector<16x96xf32> -> vector<16x96xf32>
    %c0_3 = arith.constant 0 : index
    %c0_4 = arith.constant 0 : index
    %3 = vector.load %arg4[%c0_3, %c0_4] : memref<16x16xf32, #tpu.memory_space<vmem>>, vector<16x16xf32>
    %4 = vector.extract_strided_slice %2 {offsets = [0, 0], sizes = [16, 16], strides = [1, 1]} : vector<16x96xf32> to vector<16x16xf32>
    %5 = arith.truncf %4 : vector<16x16xf32> to vector<16x16xbf16>
    %6 = vector.extract_strided_slice %2 {offsets = [0, 32], sizes = [16, 16], strides = [1, 1]} : vector<16x96xf32> to vector<16x16xf32>
    %7 = arith.truncf %6 : vector<16x16xf32> to vector<16x16xbf16>
    %8 = vector.extract_strided_slice %2 {offsets = [0, 64], sizes = [16, 16], strides = [1, 1]} : vector<16x96xf32> to vector<16x16xf32>
    %9 = arith.truncf %8 : vector<16x16xf32> to vector<16x16xbf16>
    %cst_5 = arith.constant dense<0.000000e+00> : vector<16x16xf32>
    %10 = tpu.matmul %5, %7, %cst_5 {dimension_numbers = #tpu.dot_dimension_numbers<[1], [1], [0], [0], [0, 0, 1, 0], [], []>} : vector<16x16xbf16>, vector<16x16xbf16>, vector<16x16xf32> -> vector<16x16xf32>
    %11 = arith.addf %10, %3 : vector<16x16xf32>
    %cst_6 = arith.constant dense<0xFF800000> : vector<16xf32>
    %12 = vector.multi_reduction <maximumf>, %11, %cst_6 [1] : vector<16x16xf32> to vector<16xf32>
    %13 = vector.shape_cast %12 : vector<16xf32> to vector<16x1xf32>
    %14 = vector.broadcast %13 : vector<16x1xf32> to vector<16x16xf32>
    %15 = arith.subf %11, %14 : vector<16x16xf32>
    %16 = math.exp %15 : vector<16x16xf32>
    %cst_7 = arith.constant dense<0.000000e+00> : vector<16xf32>
    %17 = vector.multi_reduction <add>, %16, %cst_7 [1] : vector<16x16xf32> to vector<16xf32>
    %18 = vector.shape_cast %17 : vector<16xf32> to vector<16x1xf32>
    %19 = arith.truncf %16 : vector<16x16xf32> to vector<16x16xbf16>
    %cst_8 = arith.constant dense<0.000000e+00> : vector<16x16xf32>
    %20 = tpu.matmul %19, %9, %cst_8 {dimension_numbers = #tpu.dot_dimension_numbers<[1], [0], [0], [1], [0, 0, 1, 1], [], []>} : vector<16x16xbf16>, vector<16x16xbf16>, vector<16x16xf32> -> vector<16x16xf32>
    %21 = vector.broadcast %18 : vector<16x1xf32> to vector<16x16xf32>
    %22 = arith.divf %20, %21 : vector<16x16xf32>
    %23 = vector.extract_strided_slice %2 {offsets = [0, 16], sizes = [16, 16], strides = [1, 1]} : vector<16x96xf32> to vector<16x16xf32>
    %24 = arith.truncf %23 : vector<16x16xf32> to vector<16x16xbf16>
    %25 = vector.extract_strided_slice %2 {offsets = [0, 48], sizes = [16, 16], strides = [1, 1]} : vector<16x96xf32> to vector<16x16xf32>
    %26 = arith.truncf %25 : vector<16x16xf32> to vector<16x16xbf16>
    %27 = vector.extract_strided_slice %2 {offsets = [0, 80], sizes = [16, 16], strides = [1, 1]} : vector<16x96xf32> to vector<16x16xf32>
    %28 = arith.truncf %27 : vector<16x16xf32> to vector<16x16xbf16>
    %cst_9 = arith.constant dense<0.000000e+00> : vector<16x16xf32>
    %29 = tpu.matmul %24, %26, %cst_9 {dimension_numbers = #tpu.dot_dimension_numbers<[1], [1], [0], [0], [0, 0, 1, 0], [], []>} : vector<16x16xbf16>, vector<16x16xbf16>, vector<16x16xf32> -> vector<16x16xf32>
    %30 = arith.addf %29, %3 : vector<16x16xf32>
    %cst_10 = arith.constant dense<0xFF800000> : vector<16xf32>
    %31 = vector.multi_reduction <maximumf>, %30, %cst_10 [1] : vector<16x16xf32> to vector<16xf32>
    %32 = vector.shape_cast %31 : vector<16xf32> to vector<16x1xf32>
    %33 = vector.broadcast %32 : vector<16x1xf32> to vector<16x16xf32>
    %34 = arith.subf %30, %33 : vector<16x16xf32>
    %35 = math.exp %34 : vector<16x16xf32>
    %cst_11 = arith.constant dense<0.000000e+00> : vector<16xf32>
    %36 = vector.multi_reduction <add>, %35, %cst_11 [1] : vector<16x16xf32> to vector<16xf32>
    %37 = vector.shape_cast %36 : vector<16xf32> to vector<16x1xf32>
    %38 = arith.truncf %35 : vector<16x16xf32> to vector<16x16xbf16>
    %cst_12 = arith.constant dense<0.000000e+00> : vector<16x16xf32>
    %39 = tpu.matmul %38, %28, %cst_12 {dimension_numbers = #tpu.dot_dimension_numbers<[1], [0], [0], [1], [0, 0, 1, 1], [], []>} : vector<16x16xbf16>, vector<16x16xbf16>, vector<16x16xf32> -> vector<16x16xf32>
    %40 = vector.broadcast %37 : vector<16x1xf32> to vector<16x16xf32>
    %41 = arith.divf %39, %40 : vector<16x16xf32>
    %c0_13 = arith.constant 0 : index
    %c0_14 = arith.constant 0 : index
    %42 = vector.load %arg3[%c0_13, %c0_14] : memref<33x32xbf16, #tpu.memory_space<vmem>>, vector<33x32xbf16>
    %43 = tpu.concatenate %22, %41 in 1 : vector<16x16xf32>, vector<16x16xf32> -> vector<16x32xf32>
    %44 = arith.truncf %43 : vector<16x32xf32> to vector<16x32xbf16>
    %45 = vector.extract_strided_slice %42 {offsets = [0, 0], sizes = [32, 32], strides = [1, 1]} : vector<33x32xbf16> to vector<32x32xbf16>
    %cst_15 = arith.constant dense<0.000000e+00> : vector<16x32xf32>
    %46 = tpu.matmul %44, %45, %cst_15 {dimension_numbers = #tpu.dot_dimension_numbers<[1], [0], [0], [1], [0, 0, 1, 1], [], []>} : vector<16x32xbf16>, vector<32x32xbf16>, vector<16x32xf32> -> vector<16x32xf32>
    %47 = vector.extract_strided_slice %42 {offsets = [32, 0], sizes = [1, 32], strides = [1, 1]} : vector<33x32xbf16> to vector<1x32xbf16>
    %48 = arith.extf %47 : vector<1x32xbf16> to vector<1x32xf32>
    %49 = vector.broadcast %48 : vector<1x32xf32> to vector<16x32xf32>
    %50 = arith.addf %46, %49 : vector<16x32xf32>
    %c0_16 = arith.constant 0 : index
    %c0_17 = arith.constant 0 : index
    %51 = vector.load %arg5[%c0_16, %c0_17] : memref<16x32xf32, #tpu.memory_space<vmem>>, vector<16x32xf32>
    tpu.vector_store %arg5[%c0_16, %c0_17], %50 {strides = array<i32>} : memref<16x32xf32, #tpu.memory_space<vmem>>, vector<16x32xf32>,
    return
  }
  func.func @transform_0(%arg0: i32) -> (i32, i32) {
    %c0_i32 = arith.constant 0 : i32
    %c0_i32_0 = arith.constant 0 : i32
    %c0_i32_1 = arith.constant 0 : i32
    return %c0_i32, %c0_i32_0 : i32, i32
  }
  func.func @transform_1(%arg0: i32) -> (i32, i32) {
    %c0_i32 = arith.constant 0 : i32
    %c0_i32_0 = arith.constant 0 : i32
    %c0_i32_1 = arith.constant 0 : i32
    return %c0_i32, %c0_i32_0 : i32, i32
  }
  func.func @transform_2(%arg0: i32) -> (i32, i32) {
    %c0_i32 = arith.constant 0 : i32
    %c0_i32_0 = arith.constant 0 : i32
    %c0_i32_1 = arith.constant 0 : i32
    return %c0_i32, %c0_i32_0 : i32, i32
  }
  func.func @transform_3(%arg0: i32) -> (i32, i32) {
    %c0_i32 = arith.constant 0 : i32
    %c0_i32_0 = arith.constant 0 : i32
    %c0_i32_1 = arith.constant 0 : i32
    return %c0_i32, %c0_i32_0 : i32, i32
  }
  func.func @transform_4(%arg0: i32) -> (i32, i32) {
    %c0_i32 = arith.constant 0 : i32
    %c0_i32_0 = arith.constant 0 : i32
    %c0_i32_1 = arith.constant 0 : i32
    return %c0_i32, %c0_i32_0 : i32, i32
  }
}

</mosaic_0001>

<bundles_post_ra>
// kernel: attention_forward.1
= control target key start
LH: loop header
LB: loop body
LE: loop exit
PB: predicated region body
PF: predicated region fallthrough
CT: control target
= control target key end

     0   :  { %s490_s0 = inlined_call_operand.vmem [shape: bf16[16,32], index: 0, kind: input, shape index: {}]   ;;  %s491_s1 = inlined_call_operand.vmem [shape: bf16[32,96], index: 1, kind: input, shape index: {}]   ;;  %s492_s2 = inlined_call_operand.vmem [shape: bf16[33,32], index: 2, kind: input, shape index: {}]   ;;  %s493_s3 = inlined_call_operand.vmem [shape: f32[16,16], index: 3, kind: input, shape index: {}]   ;;  %s494_s4 = inlined_call_operand.hbm [shape: f32[16,32], index: 4, kind: output, shape index: {}]  }
   0x1   :  { %v344_v0 = vld [vmem:[%s491_s1 + $0x8] sm:$0xff] }
   0x2   :  { %9 = vsyncpa [#allocation3], 0  ;;  %52 = vmatpush.bf16.msra.mxu0 %v344_v0  ;;  %v343_v1 = vld [vmem:[%s491_s1] sm:$0xff]  ;;  %vm42_vm0 = vcmask 261120   ;;  %s403_s21 = smov 112   ;;  %s404_s22 = smov 96  }
   0x3   :  { %v342_v2 = vld [vmem:[%s490_s0] sm:$0xff]  ;;  %s405_s23 = smov 80   ;;  %vm66_vm1 = vcmask 130048   ;;  %v61_v15 = vld [vmem:[%s493_s3 + $0x8] sm:$0xff]  ;;  %s406_s26 = smov 48  }
   0x4   :  { %v60_v11 = vld [vmem:[%s493_s3] sm:$0xff]  ;;  %s407_s27 = smov 64   ;;  %v346_v50 = vld [vmem:[%s492_s2 + $0x8] sm:$0xff]  ;;  %s408_s5 = smov 16  }
   0x5   :  { %v345_v53 = vld [vmem:[%s492_s2] sm:$0xff]  ;;  %s409_s8 = smov [#allocation2]   ;;  %s304_s12 = sshll.u32 %s494_s4, 4  ;;  %s305_s12 = int_to_ptr.hbm [resolvable:$true] %s304_s12 }
   0x6   :  { %53 = vmatpush.bf16.msra.mxu0 %v343_v1  ;;  %s302_s9 = sshll.u32 %s409_s8, 4  ;;  %s410_s13 = smov 128   ;;  %s303_s9 = int_to_ptr.vmem [resolvable:$true] %s302_s9 }
   0x9   :  { %328 = vmatmul.msk.bf16.vlgmr.msra.gmra.mxu0 %vm42_vm0, %v342_v2 }
   0xa   :  { %288 = vmatpush.bf16.msrb.mxu0 %v346_v50 }
   0xe   :  { %289 = vmatpush.bf16.msrb.mxu0 %v345_v53 }
  0x86   :  { %v55_v3 = vpop.f32.mrf.mxu0 }
  0x8e   :  { %v57_v4 = vpop.f32.mrf.mxu0 }
  0x8f   :  { %v62_v5 = vpack.c.bf16 %v57_v4, %v55_v3 }
  0x91   :  { %156 = vrot.lane.b32.xlu1 %v62_v5, %s403_s21  ;;  %64 = vrot.lane.b32.xlu0 %v62_v5, %s404_s22 }
  0x99   :  { %158 = vrot.lane.b32.xlu0 %v62_v5, %s405_s23 }
 0x103   :  { %v65_v6 = vpop.permute.xlu0 %64  ;;  %v157_v10 = vpop.permute.xlu1 %156 }
 0x104   :  { %v71_v7 = vsel %vm66_vm1, %v65_v6, 0 }
 0x105   :  { %80 = vmatpush.bf16.xpose.msra.mxu1 %v71_v7 }
 0x10b   :  { %v159_v8 = vpop.permute.xlu0 %158 }
 0x10c   :  { %329 = vmatmul.msk.bf16.vlgmr.msra.gmra.mxu1 %vm66_vm1, %v62_v5  ;;  %v164_v9 = vsel %vm66_vm1, %v159_v8, 0 }
 0x10d   :  { %173 = vmatpush.bf16.xpose.msra.mxu3 %v164_v9 }
 0x114   :  { %331 = vmatmul.msk.bf16.vlgmr.msra.gmra.mxu3 %vm66_vm1, %v157_v10 }
 0x189   :  { %v82_v12 = vpop.f32.mrf.mxu1 }
 0x18a   :  { %v83_v13 = vadd.f32 %v82_v12, %v60_v11 }
 0x18c   :  { %v87_v14 = vsel %vm66_vm1, %v83_v13, -inf }
 0x18d   :  { %88 = vmax.xlane.f32.xlu1 %v87_v14 }
 0x191   :  { %v84_v16 = vpop.f32.mrf.mxu1 }
 0x192   :  { %v85_v17 = vadd.f32 %v84_v16, %v61_v15 }
 0x194   :  { %v90_v18 = vsel %vm66_vm1, %v85_v17, -inf }
 0x195   :  { %91 = vmax.xlane.f32.xlu2 %v90_v18 }
 0x197   :  { %v175_v19 = vpop.f32.mrf.mxu3 }
 0x198   :  { %v176_v20 = vadd.f32 %v175_v19, %v60_v11 }
 0x19a   :  { %v180_v21 = vsel %vm66_vm1, %v176_v20, -inf }
 0x19b   :  { %181 = vmax.xlane.f32.xlu0 %v180_v21 }
 0x19f   :  { %v177_v22 = vpop.f32.mrf.mxu3 }
 0x1a0   :  { %v178_v23 = vadd.f32 %v177_v22, %v61_v15 }
 0x1a2   :  { %v183_v24 = vsel %vm66_vm1, %v178_v23, -inf }
 0x1a6   :  { %199 = vrot.lane.b32.xlu1 %v62_v5, %s406_s26 }
 0x1ad   :  { %106 = vrot.lane.b32.xlu2 %v62_v5, %s407_s27 }
 0x1d6   :  { %184 = vmax.xlane.f32.xlu2 %v183_v24 }
 0x200   :  { %v89_v25 = vpop.xlane.xlu1 %88 }
 0x201   :  { %v93_v26 = vsub.f32 %v83_v13, %v89_v25 }
 0x203   :  { %v95_v27 = vmul.f32 1.442695, %v93_v26 }
 0x205   :  { %361 = vpow2.f32 %v95_v27 }
 0x208   :  { %v92_v28 = vpop.xlane.xlu2 %91 }
 0x209   :  { %v94_v29 = vsub.f32 %v85_v17, %v92_v28 }
 0x20b   :  { %v362_v30 = vpop.eup %361  ;;  %v97_v31 = vmul.f32 1.442695, %v94_v29 }
 0x20c   :  { %v99_v32 = vsel %vm66_vm1, %v362_v30, 0.0 }
 0x20d   :  { %363 = vpow2.f32 %v97_v31  ;;  %100 = vadd.xlane.f32.xlu2 %v99_v32 }
 0x20e   :  { %v182_v33 = vpop.xlane.xlu0 %181 }
 0x20f   :  { %v186_v34 = vsub.f32 %v176_v20, %v182_v33 }
 0x210   :  { %v107_v35 = vpop.permute.xlu2 %106 }
 0x211   :  { %v188_v36 = vmul.f32 1.442695, %v186_v34  ;;  %119 = vmatpush.bf16.msra.mxu2 %v107_v35 }
 0x213   :  { %v364_v37 = vpop.eup %363  ;;  %365 = vpow2.f32 %v188_v36 }
 0x214   :  { %v105_v38 = vpack.c.bf16 %v364_v37, %v362_v30  ;;  %v102_v48 = vsel %vm66_vm1, %v364_v37, 0.0 }
 0x216   :  { %330 = vmatmul.msk.bf16.vlgmr.msra.gmra.mxu2 %vm66_vm1, %v105_v38 }
 0x218   :  { %v200_v39 = vpop.permute.xlu1 %199 }
 0x219   :  { %v366_v40 = vpop.eup %365  ;;  %212 = vmatpush.bf16.msrb.mxu2 %v200_v39 }
 0x21a   :  { %v192_v41 = vsel %vm66_vm1, %v366_v40, 0.0 }
 0x21b   :  { %193 = vadd.xlane.f32.xlu0 %v192_v41 }
 0x249   :  { %v185_v42 = vpop.xlane.xlu2 %184 }
 0x24a   :  { %v187_v43 = vsub.f32 %v178_v23, %v185_v42 }
 0x24c   :  { %v190_v44 = vmul.f32 1.442695, %v187_v43 }
 0x24e   :  { %367 = vpow2.f32 %v190_v44 }
 0x254   :  { %v368_v45 = vpop.eup %367 }
 0x255   :  { %v195_v46 = vsel %vm66_vm1, %v368_v45, 0.0  ;;  %v198_v47 = vpack.c.bf16 %v368_v45, %v366_v40 }
 0x256   :  { %196 = vadd.xlane.f32.xlu0 %v195_v46  ;;  %v253_v46 = vld [vmem:[%s492_s2 + $0x10] sm:$0x1]  ;;  %s411_s2 = smov 8  }
 0x257   :  { %332 = vmatmul.msk.bf16.vlgmr.msrb.gmra.mxu2 %vm66_vm1, %v198_v47  ;;  %v265_v47 = vunpack.c.l.bf16 %v253_v46 }
 0x25e   :  { %103 = vadd.xlane.f32.xlu0 %v102_v48  ;;  %v266_v48 = vperm.slane %v265_v47, 0 }
 0x280   :  { %v101_v17 = vpop.xlane.xlu2 %100 }
 0x281   :  { %v137_v30 = vand.u32 2147483648, %v101_v17  ;;  %vm131_vm14 = vweird.f32 %v101_v17  ;;  %v135_v31 = vand.u32 2147483647, %v101_v17 }
 0x283   :  { %v138_v35 = vor.u32 1.1754944e-38, %v137_v30 }
 0x28e   :  { %v194_v49 = vpop.xlane.xlu0 %193 }
 0x28f   :  { %369 = vrcp.f32 %v194_v49  ;;  %vm224_vm4 = vweird.f32 %v194_v49  ;;  %v230_v2 = vand.u32 2147483648, %v194_v49  ;;  %v228_v4 = vand.u32 2147483647, %v194_v49 }
 0x291   :  { %v231_v8 = vor.u32 1.1754944e-38, %v230_v2  ;;  %vm229_vm8 = vcmp.eq.f32.partialorder %v228_v4, 8.507059e+37 }
 0x295   :  { %v370_v54 = vpop.eup %369 }
 0x296   :  { %v220_v55 = vmul.f32 %v370_v54, %v194_v49  ;;  %vm225_vm2 = vweird.f32 %v370_v54 }
 0x297   :  { %vm226_vm5 = vmor %vm224_vm4, %vm225_vm2 }
 0x298   :  { %v221_v59 = vsub.f32 1.0, %v220_v55 }
 0x299   :  { %v470_v51 = vpop.f32.mrf.mxu2 }
 0x29a   :  { %v222_v61 = vmul.f32 %v370_v54, %v221_v59 }
 0x29c   :  { %v223_v0 = vadd.f32 %v370_v54, %v222_v61 }
 0x29e   :  { %v227_v6 = vsel %vm226_vm5, %v370_v54, %v223_v0 }
 0x29f   :  { %v232_v10 = vsel %vm229_vm8, %v231_v8, %v227_v6 }
 0x2a1   :  { %v475_v58 = vpop.f32.mrf.mxu2 }
 0x2c9   :  { %v197_v52 = vpop.xlane.xlu0 %196 }
 0x2ca   :  { %371 = vrcp.f32 %v197_v52  ;;  %v245_v3 = vand.u32 2147483648, %v197_v52  ;;  %vm239_vm6 = vweird.f32 %v197_v52  ;;  %v243_v5 = vand.u32 2147483647, %v197_v52 }
 0x2cc   :  { %v246_v9 = vor.u32 1.1754944e-38, %v245_v3  ;;  %vm244_vm9 = vcmp.eq.f32.partialorder %v243_v5, 8.507059e+37 }
 0x2d0   :  { %v372_v56 = vpop.eup %371 }
 0x2d1   :  { %v235_v57 = vmul.f32 %v372_v56, %v197_v52  ;;  %vm240_vm3 = vweird.f32 %v372_v56  ;;  %v104_v16 = vpop.xlane.xlu0 %103 }
 0x2d2   :  { %vm241_vm7 = vmor %vm239_vm6, %vm240_vm3  ;;  %373 = vrcp.f32 %v104_v16  ;;  %v152_v27 = vand.u32 2147483648, %v104_v16  ;;  %vm146_vm12 = vweird.f32 %v104_v16  ;;  %v150_v29 = vand.u32 2147483647, %v104_v16 }
 0x2d3   :  { %v236_v60 = vsub.f32 1.0, %v235_v57  ;;  %375 = vrcp.f32 %v101_v17  ;;  %vm136_vm3 = vcmp.eq.f32.partialorder %v135_v31, 8.507059e+37 }
 0x2d4   :  { %v153_v33 = vor.u32 1.1754944e-38, %v152_v27  ;;  %vm151_vm2 = vcmp.eq.f32.partialorder %v150_v29, 8.507059e+37 }
 0x2d5   :  { %v237_v62 = vmul.f32 %v372_v56, %v236_v60 }
 0x2d7   :  { %v238_v1 = vadd.f32 %v372_v56, %v237_v62 }
 0x2d8   :  { %v374_v18 = vpop.eup %373 }
 0x2d9   :  { %v242_v7 = vsel %vm241_vm7, %v372_v56, %v238_v1  ;;  %v376_v19 = vpop.eup %375  ;;  %v142_v20 = vmul.f32 %v374_v18, %v104_v16  ;;  %vm147_vm10 = vweird.f32 %v374_v18 }
 0x2da   :  { %v214_v63 = vpop.f32.mrf.mxu2  ;;  %v247_v12 = vsel %vm244_vm9, %v246_v9, %v242_v7  ;;  %v127_v21 = vmul.f32 %v376_v19, %v101_v17  ;;  %vm132_vm11 = vweird.f32 %v376_v19  ;;  %vm148_vm13 = vmor %vm146_vm12, %vm147_vm10 }
 0x2db   :  { %v233_v13 = vmul.f32 %v232_v10, %v214_v63  ;;  %v143_v22 = vsub.f32 1.0, %v142_v20  ;;  %vm133_vm15 = vmor %vm131_vm14, %vm132_vm11 }
 0x2dc   :  { %v128_v23 = vsub.f32 1.0, %v127_v21 }
 0x2dd   :  { %v144_v24 = vmul.f32 %v374_v18, %v143_v22 }
 0x2de   :  { %v129_v25 = vmul.f32 %v376_v19, %v128_v23 }
 0x2df   :  { %v145_v26 = vadd.f32 %v374_v18, %v144_v24 }
 0x2e0   :  { %v130_v28 = vadd.f32 %v376_v19, %v129_v25 }
 0x2e1   :  { %v149_v32 = vsel %vm148_vm13, %v374_v18, %v145_v26 }
 0x2e2   :  { %v216_v11 = vpop.f32.mrf.mxu2  ;;  %v134_v34 = vsel %vm133_vm15, %v376_v19, %v130_v28  ;;  %v154_v36 = vsel %vm151_vm2, %v153_v33, %v149_v32 }
 0x2e3   :  { %v248_v14 = vmul.f32 %v247_v12, %v216_v11  ;;  %v139_v37 = vsel %vm136_vm3, %v138_v35, %v134_v34  ;;  %v155_v42 = vmul.f32 %v154_v36, %v475_v58 }
 0x2e4   :  { %v140_v39 = vmul.f32 %v139_v37, %v470_v51 }
 0x2e5   :  { %v356_v15 = vpack.i.bf16 %v248_v14, %v233_v13 }
 0x2e7   :  { %357 = vrot.lane.b32.xlu1 %v356_v15, %s408_s5 }
 0x359   :  { %v358_v38 = vpop.permute.xlu1 %357 }
 0x35a   :  { %v360_v40 = vunpack.i.h.bf16 %v358_v38  ;;  %v359_v41 = vunpack.i.l.bf16 %v358_v38 }
 0x35c   :  { %v262_v43 = vsel %vm66_vm1, %v140_v39, %v359_v41  ;;  %v263_v44 = vsel %vm66_vm1, %v155_v42, %v360_v40 }
 0x35d   :  { %v264_v45 = vpack.c.bf16 %v263_v44, %v262_v43 }
 0x35f   :  { %341 = vmatmul.msk.bf16.vlgmr.msrb.gmra.mxu0 %vm42_vm0, %v264_v45 }
 0x3dc   :  { %v291_v49 = vpop.f32.mrf.mxu0 }
 0x3dd   :  { %v292_v50 = vadd.f32 %v291_v49, %v266_v48 }
 0x3df   :  { %296 = vst.msk [vmem:[#allocation2] sm:$0xff] %vm42_vm0, %v292_v50 }
 0x3e4   :  { %v293_v51 = vpop.f32.mrf.mxu0 }
 0x3e5   :  { %v294_v52 = vadd.f32 %v293_v51, %v266_v48 }
 0x3e7   :  { %297 = vst.msk [vmem:[#allocation2 + $0x8] sm:$0xff] %vm42_vm0, %v294_v52 }
 0x3e8   :  { %310 = dma.vmem_to_hbm [thread:$0]  %s303_s9, 256, %s305_s12, [#allocation3], %s410_s13, %s410_s13, %s411_s2  }
 0x3e9   :  { %401 = dma.done.wait [#allocation3], 256  }
 0x3ea   :  { %402 = vsyncadd [#allocation3], 4294967040 }
 0x3eb   :  { %315 = vsyncpa [#allocation3], 1 }

</bundles_post_ra>
